<compile_context>
chip_gen: v5e
topology: v5e:2x2
jax: 0.10.0
libtpu: 0.0.40
codegen_flags: <defaults>
</compile_context>

<pallas_src>
import functools
import numpy as np
import jax
import jax.numpy as jnp
from jax.experimental import pallas as pl
from jax.experimental.pallas import tpu as pltpu

IN_CHANNELS = 32            # inner_channels
COND_CHANNELS = 80
COND_HOP = 8                # cond_hop_length
UPSAMPLE = 8                # upsample_ratios
KT = UPSAMPLE * 2           # ConvTranspose1d kernel size = 16
CT_PAD = UPSAMPLE // 2 + UPSAMPLE % 2   # = 4
CONV_K = 3                  # conv_kernel_size
NOISE_DIM = 512             # diffusion_step_embed_dim_out
WIN = COND_HOP + 2          # unfold window = hop + 2*padding = 10

C = IN_CHANNELS
PHC = UPSAMPLE * C          # 256 = phase-packed lane width


def _leaky(v):
    return jnp.where(v > 0, v, 0.2 * v)


# ---------------------------------------------------------------------------
# Pallas kernel: one (batch, time-tile) block of the LVC hot path.
#   xcat_ref : (1, 1, tlx+2, 3C)   [x_prev | x_cur | x_next], leaky-applied
#   ad_ref   : (1, 1, tlx+2, 8C)   audio_down, phase-packed
#   w0p_ref  : (3C, 8C)            packed ConvTranspose1d weights
#   w2p_ref  : (10C, 8C)           packed (banded) Conv1d weights
#   o_ref    : (1, 1, tlx,   8C)   y2 (after the 2nd leaky), phase-packed
# Rows 0 and tlx+1 of the inputs are the 1-frame halo (zero at sequence ends).
# ---------------------------------------------------------------------------
def _lvc_tile_kernel(xcat_ref, ad_ref, w0p_ref, w2p_ref, o_ref, *, tlx):
    xcat = xcat_ref[0, 0]                                       # (tlx+2, 96)

    # (1)+(2) transposed conv: all 8 phases in one MXU pass, then +audio_down, leaky.
    up = jnp.dot(xcat, w0p_ref[...], preferred_element_type=jnp.float32)   # (tlx+2, 256)
    y = _leaky(up + ad_ref[0, 0])                                          # (tlx+2, 256)

    # (3) Conv1d(k=3, pad=1) in phase-packed layout.
    # Output frame j / phase p needs y at times 8j+p-1 .. 8j+p+1:
    #   y_mid : times 8j .. 8j+7        -> the frame's own 256 lanes
    #   y_lo  : time 8j-1               -> phase 7 of the previous frame
    #   y_hi  : time 8j+8               -> phase 0 of the next frame
    y_mid = y[1:tlx + 1, :]
    y_lo = y[0:tlx, (UPSAMPLE - 1) * C:PHC]
    y_hi = y[2:tlx + 2, 0:C]
    acc = jnp.dot(y_mid, w2p_ref[C:C + PHC, :], preferred_element_type=jnp.float32)
    acc = acc + jnp.dot(y_lo, w2p_ref[0:C, :], preferred_element_type=jnp.float32)
    acc = acc + jnp.dot(y_hi, w2p_ref[C + PHC:WIN * C, :],
                        preferred_element_type=jnp.float32)
    o_ref[0, 0] = _leaky(acc)


# ---------------------------------------------------------------------------
# Weight packing (trace-time, plain XLA).
# ---------------------------------------------------------------------------
def _pack_w0(w0):
    # w0: (Cin, Cout, 16) ConvTranspose1d weight.
    # up[8j+p, o] =  sum_i x[j,  i] * w0[i,o,p+4]
    #             +  sum_i x[j-1,i] * w0[i,o,p+12]   (p < 4)
    #             +  sum_i x[j+1,i] * w0[i,o,p-4]    (p >= 4)
    # Rows 0:32 = prev frame, 32:64 = cur frame, 64:96 = next frame.
    w0pack = jnp.zeros((3 * C, PHC), jnp.float32)
    for p in range(UPSAMPLE):
        cols = slice(p * C, (p + 1) * C)
        w0pack = w0pack.at[C:2 * C, cols].set(w0[:, :, p + CT_PAD])
        if p < UPSAMPLE // 2:
            w0pack = w0pack.at[0:C, cols].set(w0[:, :, p + CT_PAD + UPSAMPLE])
        else:
            w0pack = w0pack.at[2 * C:3 * C, cols].set(w0[:, :, p - CT_PAD])
    return w0pack


def _pack_w2(w2):
    # w2: (Cout, Cin, 3) Conv1d weight.  Banded packing over 10 input lane-blocks:
    # block q corresponds to input time 8j+q-1; output phase p uses blocks p, p+1, p+2.
    w2pack = jnp.zeros((WIN * C, PHC), jnp.float32)
    for p in range(UPSAMPLE):
        for k in range(CONV_K):
            w2pack = w2pack.at[(p + k) * C:(p + k + 1) * C,
                               p * C:(p + 1) * C].set(w2[:, :, k].T)
    return w2pack


# ---------------------------------------------------------------------------
# Forward wrapper.
# ---------------------------------------------------------------------------
def lvc_forward(x, audio_down, c, noise_embedding, w0, w1, w2, *, tlx=None):
    B, Cin, Lx = x.shape
    T = UPSAMPLE * Lx
    assert Cin == C and audio_down.shape == (B, C, T)
    kernel_length = T // COND_HOP
    assert T == kernel_length * COND_HOP
    # TODO(synk): KernelPredictor is not defined in the provided source; its outputs
    # (kernels, bias) are only shape-used before the forward's early return, so they
    # cannot affect the returned tensor and are not synthesized.

    # condition = c + fc_t(noise_embedding)[..., None]  (value-unused by y; fc_t bias
    # is never initialized in the spec, so only the weight term is reproduced).
    condition = c + jnp.dot(noise_embedding, w1.T)[:, :, None]

    # packed weights (trace-time constants)
    w0pack = _pack_w0(w0)
    w2pack = _pack_w2(w2)

    # layout plumbing (plain XLA): leaky(x), build [prev|cur|next] concat, and
    # reshape audio_down to the phase-packed (B, Lx, 256) layout.
    xlt = jnp.transpose(_leaky(x), (0, 2, 1))                     # (B, Lx, C)
    zf = jnp.zeros((B, 1, C), jnp.float32)
    xcat = jnp.concatenate(
        [jnp.concatenate([zf, xlt[:, :-1]], axis=1),              # x[j-1]
         xlt,                                                     # x[j]
         jnp.concatenate([xlt[:, 1:], zf], axis=1)],              # x[j+1]
        axis=-1)                                                  # (B, Lx, 96)
    adp = jnp.transpose(audio_down, (0, 2, 1)).reshape(B, Lx, PHC)  # (B, Lx, 256)

    # time tiling with a 1-frame halo on each side (halo baked into the windows,
    # so BlockSpecs stay plain non-overlapping blocks).
    if tlx is None:
        tlx = min(Lx, 512)
    n_tiles = pl.cdiv(Lx, tlx)
    Lp = n_tiles * tlx
    pad_f = Lp - Lx
    xcat_h = jnp.pad(xcat, ((0, 0), (1, 1 + pad_f), (0, 0)))
    adp_h = jnp.pad(adp, ((0, 0), (1, 1 + pad_f), (0, 0)))
    idx = (jnp.arange(n_tiles) * tlx)[:, None] + jnp.arange(tlx + 2)[None, :]
    xcat_t = xcat_h[:, idx, :]                                    # (B, nt, tlx+2, 96)
    adp_t = adp_h[:, idx, :]                                      # (B, nt, tlx+2, 256)

    kern = functools.partial(_lvc_tile_kernel, tlx=tlx)
    y2_pack = pl.pallas_call(
        kern,
        out_shape=jax.ShapeDtypeStruct((B, n_tiles, tlx, PHC), jnp.float32),
        grid=(B, n_tiles),
        in_specs=[
            pl.BlockSpec((1, 1, tlx + 2, 3 * C), lambda b, t: (b, t, 0, 0)),
            pl.BlockSpec((1, 1, tlx + 2, PHC), lambda b, t: (b, t, 0, 0)),
            pl.BlockSpec((3 * C, PHC), lambda b, t: (0, 0)),
            pl.BlockSpec((WIN * C, PHC), lambda b, t: (0, 0)),
        ],
        out_specs=pl.BlockSpec((1, 1, tlx, PHC), lambda b, t: (b, t, 0, 0)),
        compiler_params=pltpu.CompilerParams(
            dimension_semantics=("parallel", "parallel")),
    )(xcat_t, adp_t, w0pack, w2pack)

    # un-tile, go time-major, and do the stride-8 / width-10 Unfold in plain XLA.
    y2 = y2_pack.reshape(B, Lp, PHC)[:, :Lx].reshape(B, T, C)
    y2p = jnp.pad(y2, ((0, 0), (1, 1), (0, 0)))                   # (B, T+2, C)
    windows = jnp.stack(
        [y2p[:, j:j + COND_HOP * Lx:COND_HOP, :] for j in range(WIN)], axis=2)
    y = jnp.transpose(windows, (0, 3, 2, 1)).reshape(B, C * WIN, Lx)
    return y, condition


# ---------------------------------------------------------------------------
# plain-numpy transcription of the torch forward (correctness check)
# ---------------------------------------------------------------------------
def _numpy_reference(x, audio_down, w0, w2):
    B, Cc, Lx = x.shape
    T = UPSAMPLE * Lx
    lrelu = lambda a: np.where(a > 0, a, 0.2 * a).astype(np.float32)
    xl = lrelu(x)
    up = np.zeros((B, Cc, T), np.float32)
    for s in range(Lx):
        for k in range(KT):
            tt = UPSAMPLE * s - CT_PAD + k
            if 0 <= tt < T:
                up[:, :, tt] += np.einsum('ni,io->no', xl[:, :, s], w0[:, :, k])
    y = lrelu(up + audio_down)
    yp = np.pad(y, ((0, 0), (0, 0), (1, 1)))
    conv = np.zeros((B, Cc, T), np.float32)
    for k in range(CONV_K):
        conv += np.einsum('oi,nit->not', w2[:, :, k], yp[:, :, k:k + T])
    y2 = lrelu(conv)
    y2p = np.pad(y2, ((0, 0), (0, 0), (1, 1)))
    out = np.zeros((B, Cc * WIN, Lx), np.float32)
    for ch in range(Cc):
        for j in range(WIN):
            for b in range(Lx):
                out[:, ch * WIN + j, b] = y2p[:, ch, COND_HOP * b + j]
    return out


if __name__ == "__main__":
    key = jax.random.PRNGKey(0)
    ks = jax.random.split(key, 7)
    B, Lx = 2, 8
    T = UPSAMPLE * Lx
    Lc = T // COND_HOP

    # inputs
    x = jax.random.uniform(ks[0], (B, C, Lx), jnp.float32, -1.0, 1.0)
    audio_down = jax.random.uniform(ks[1], (B, C, T), jnp.float32, -1.0, 1.0)
    c = jax.random.uniform(ks[2], (B, COND_CHANNELS, Lc), jnp.float32, -1.0, 1.0)
    noise_embedding = jax.random.uniform(ks[3], (B, NOISE_DIM), jnp.float32, -1.0, 1.0)

    # parameters (shapes as in the torch __init__ / w0, w1, w2)
    w0 = jax.random.uniform(ks[4], (C, C, KT), jnp.float32)                  # ConvTranspose1d
    w1 = jax.random.uniform(ks[5], (COND_CHANNELS, NOISE_DIM), jnp.float32)  # fc_t
    w2 = jax.random.uniform(ks[6], (C, C, CONV_K), jnp.float32)              # Conv1d

    fwd = jax.jit(lvc_forward, static_argnames=("tlx",))

    # run 1: single-tile path
    y, cond = fwd(x, audio_down, c, noise_embedding, w0, w1, w2)
    jax.block_until_ready(y)
    jax.block_until_ready(cond)
    ref = _numpy_reference(np.asarray(x), np.asarray(audio_down),
                           np.asarray(w0), np.asarray(w2))
    np.testing.assert_allclose(np.asarray(y), ref, rtol=3e-2, atol=1e-1)

    # run 2: multi-tile path with halo and a non-multiple tile size (Lx=20, tlx=8)
    ks2 = jax.random.split(jax.random.PRNGKey(1), 2)
    Lx2 = 20
    T2 = UPSAMPLE * Lx2
    x2 = jax.random.uniform(ks2[0], (B, C, Lx2), jnp.float32, -1.0, 1.0)
    ad2 = jax.random.uniform(ks2[1], (B, C, T2), jnp.float32, -1.0, 1.0)
    c2 = jnp.zeros((B, COND_CHANNELS, T2 // COND_HOP), jnp.float32)
    y_2, _ = fwd(x2, ad2, c2, noise_embedding, w0, w1, w2, tlx=8)
    jax.block_until_ready(y_2)
    ref2 = _numpy_reference(np.asarray(x2), np.asarray(ad2),
                            np.asarray(w0), np.asarray(w2))
    np.testing.assert_allclose(np.asarray(y_2), ref2, rtol=3e-2, atol=1e-1)

    print("KERNEL_OK")
</pallas_src>

<mosaic_0001>
module attributes {stable_mosaic.version = 11 : i64} {
  func.func @_lvc_tile_kernel(%arg0: i32, %arg1: i32, %arg2: memref<1x1x10x96xf32, #tpu.memory_space<vmem>>, %arg3: memref<1x1x10x256xf32, #tpu.memory_space<vmem>>, %arg4: memref<96x256xf32, #tpu.memory_space<vmem>>, %arg5: memref<320x256xf32, #tpu.memory_space<vmem>>, %arg6: memref<1x1x8x256xf32, #tpu.memory_space<vmem>>) attributes {dimension_semantics = [#tpu.dimension_semantics<parallel>, #tpu.dimension_semantics<parallel>], iteration_bounds = array<i64: 2, 1>, scalar_prefetch = 0 : i64, scratch_operands = 0 : i64, tpu.core_type = #tpu.core_type<tc>, window_params = [{transform_indices = @transform_0, window_bounds = array<i64: 1, 1, 10, 96>}, {transform_indices = @transform_1, window_bounds = array<i64: 1, 1, 10, 256>}, {pipeline_mode = #tpu.pipeline_mode<synchronous>, transform_indices = @transform_2, window_bounds = array<i64: 96, 256>}, {pipeline_mode = #tpu.pipeline_mode<synchronous>, transform_indices = @transform_3, window_bounds = array<i64: 320, 256>}, {transform_indices = @transform_4, window_bounds = array<i64: 1, 1, 8, 256>}]} {
    %c0 = arith.constant 0 : index
    %c0_0 = arith.constant 0 : index
    %c0_1 = arith.constant 0 : index
    %c0_2 = arith.constant 0 : index
    %0 = vector.load %arg2[%c0, %c0_0, %c0_1, %c0_2] : memref<1x1x10x96xf32, #tpu.memory_space<vmem>>, vector<1x1x10x96xf32>
    %1 = vector.shape_cast %0 : vector<1x1x10x96xf32> to vector<10x96xf32>
    %c0_3 = arith.constant 0 : index
    %c0_4 = arith.constant 0 : index
    %2 = vector.load %arg4[%c0_3, %c0_4] : memref<96x256xf32, #tpu.memory_space<vmem>>, vector<96x256xf32>
    %cst = arith.constant dense<0.000000e+00> : vector<10x256xf32>
    %3 = tpu.matmul %1, %2, %cst {dimension_numbers = #tpu.dot_dimension_numbers<[1], [0], [0], [1], [0, 0, 1, 1], [], []>} : vector<10x96xf32>, vector<96x256xf32>, vector<10x256xf32> -> vector<10x256xf32>
    %c0_5 = arith.constant 0 : index
    %c0_6 = arith.constant 0 : index
    %c0_7 = arith.constant 0 : index
    %c0_8 = arith.constant 0 : index
    %4 = vector.load %arg3[%c0_5, %c0_6, %c0_7, %c0_8] : memref<1x1x10x256xf32, #tpu.memory_space<vmem>>, vector<1x1x10x256xf32>
    %5 = vector.shape_cast %4 : vector<1x1x10x256xf32> to vector<10x256xf32>
    %6 = arith.addf %3, %5 : vector<10x256xf32>
    %cst_9 = arith.constant 0.000000e+00 : f32
    %7 = vector.broadcast %cst_9 : f32 to vector<10x256xf32>
    %8 = arith.cmpf ogt, %6, %7 : vector<10x256xf32>
    %cst_10 = arith.constant 2.000000e-01 : f32
    %9 = vector.broadcast %cst_10 : f32 to vector<10x256xf32>
    %10 = arith.mulf %9, %6 : vector<10x256xf32>
    %11 = arith.select %8, %6, %10 : vector<10x256xi1>, vector<10x256xf32>
    %12 = vector.extract_strided_slice %11 {offsets = [1, 0], sizes = [8, 256], strides = [1, 1]} : vector<10x256xf32> to vector<8x256xf32>
    %13 = vector.extract_strided_slice %11 {offsets = [0, 224], sizes = [8, 32], strides = [1, 1]} : vector<10x256xf32> to vector<8x32xf32>
    %14 = vector.extract_strided_slice %11 {offsets = [2, 0], sizes = [8, 32], strides = [1, 1]} : vector<10x256xf32> to vector<8x32xf32>
    %c32 = arith.constant 32 : index
    %c0_11 = arith.constant 0 : index
    %15 = vector.load %arg5[%c32, %c0_11] : memref<320x256xf32, #tpu.memory_space<vmem>>, vector<256x256xf32>
    %cst_12 = arith.constant dense<0.000000e+00> : vector<8x256xf32>
    %16 = tpu.matmul %12, %15, %cst_12 {dimension_numbers = #tpu.dot_dimension_numbers<[1], [0], [0], [1], [0, 0, 1, 1], [], []>} : vector<8x256xf32>, vector<256x256xf32>, vector<8x256xf32> -> vector<8x256xf32>
    %c0_13 = arith.constant 0 : index
    %c0_14 = arith.constant 0 : index
    %17 = vector.load %arg5[%c0_13, %c0_14] : memref<320x256xf32, #tpu.memory_space<vmem>>, vector<32x256xf32>
    %cst_15 = arith.constant dense<0.000000e+00> : vector<8x256xf32>
    %18 = tpu.matmul %13, %17, %cst_15 {dimension_numbers = #tpu.dot_dimension_numbers<[1], [0], [0], [1], [0, 0, 1, 1], [], []>} : vector<8x32xf32>, vector<32x256xf32>, vector<8x256xf32> -> vector<8x256xf32>
    %19 = arith.addf %16, %18 : vector<8x256xf32>
    %c288 = arith.constant 288 : index
    %c0_16 = arith.constant 0 : index
    %20 = vector.load %arg5[%c288, %c0_16] : memref<320x256xf32, #tpu.memory_space<vmem>>, vector<32x256xf32>
    %cst_17 = arith.constant dense<0.000000e+00> : vector<8x256xf32>
    %21 = tpu.matmul %14, %20, %cst_17 {dimension_numbers = #tpu.dot_dimension_numbers<[1], [0], [0], [1], [0, 0, 1, 1], [], []>} : vector<8x32xf32>, vector<32x256xf32>, vector<8x256xf32> -> vector<8x256xf32>
    %22 = arith.addf %19, %21 : vector<8x256xf32>
    %cst_18 = arith.constant 0.000000e+00 : f32
    %23 = vector.broadcast %cst_18 : f32 to vector<8x256xf32>
    %24 = arith.cmpf ogt, %22, %23 : vector<8x256xf32>
    %cst_19 = arith.constant 2.000000e-01 : f32
    %25 = vector.broadcast %cst_19 : f32 to vector<8x256xf32>
    %26 = arith.mulf %25, %22 : vector<8x256xf32>
    %27 = arith.select %24, %22, %26 : vector<8x256xi1>, vector<8x256xf32>
    %c0_20 = arith.constant 0 : index
    %c0_21 = arith.constant 0 : index
    %c0_22 = arith.constant 0 : index
    %c0_23 = arith.constant 0 : index
    %28 = vector.load %arg6[%c0_20, %c0_21, %c0_22, %c0_23] : memref<1x1x8x256xf32, #tpu.memory_space<vmem>>, vector<1x1x8x256xf32>
    %29 = vector.shape_cast %28 : vector<1x1x8x256xf32> to vector<8x256xf32>
    %30 = vector.shape_cast %27 : vector<8x256xf32> to vector<1x1x8x256xf32>
    tpu.vector_store %arg6[%c0_20, %c0_21, %c0_22, %c0_23], %30 {strides = array<i32>} : memref<1x1x8x256xf32, #tpu.memory_space<vmem>>, vector<1x1x8x256xf32>,
    return
  }
  func.func @transform_0(%arg0: i32, %arg1: i32) -> (i32, i32, i32, i32) {
    %c0_i32 = arith.constant 0 : i32
    %c0_i32_0 = arith.constant 0 : i32
    %c0_i32_1 = arith.constant 0 : i32
    return %arg0, %arg1, %c0_i32, %c0_i32_0 : i32, i32, i32, i32
  }
  func.func @transform_1(%arg0: i32, %arg1: i32) -> (i32, i32, i32, i32) {
    %c0_i32 = arith.constant 0 : i32
    %c0_i32_0 = arith.constant 0 : i32
    %c0_i32_1 = arith.constant 0 : i32
    return %arg0, %arg1, %c0_i32, %c0_i32_0 : i32, i32, i32, i32
  }
  func.func @transform_2(%arg0: i32, %arg1: i32) -> (i32, i32) {
    %c0_i32 = arith.constant 0 : i32
    %c0_i32_0 = arith.constant 0 : i32
    %c0_i32_1 = arith.constant 0 : i32
    return %c0_i32, %c0_i32_0 : i32, i32
  }
  func.func @transform_3(%arg0: i32, %arg1: i32) -> (i32, i32) {
    %c0_i32 = arith.constant 0 : i32
    %c0_i32_0 = arith.constant 0 : i32
    %c0_i32_1 = arith.constant 0 : i32
    return %c0_i32, %c0_i32_0 : i32, i32
  }
  func.func @transform_4(%arg0: i32, %arg1: i32) -> (i32, i32, i32, i32) {
    %c0_i32 = arith.constant 0 : i32
    %c0_i32_0 = arith.constant 0 : i32
    %c0_i32_1 = arith.constant 0 : i32
    return %arg0, %arg1, %c0_i32, %c0_i32_0 : i32, i32, i32, i32
  }
}

</mosaic_0001>

<bundles_post_ra>
// kernel: lvc_forward.1
= control target key start
LH: loop header
LB: loop body
LE: loop exit
PB: predicated region body
PF: predicated region fallthrough
CT: control target
= control target key end

     0   :  { %s849_s15 = smov 0   ;;  %s851_s16 = smov 0   ;;  %s1225_s0 = inlined_call_operand.vmem [shape: f32[2,1,10,96], index: 0, kind: input, shape index: {}]   ;;  %s1226_s1 = inlined_call_operand.vmem [shape: f32[2,1,10,256], index: 1, kind: input, shape index: {}]   ;;  %s1227_s2 = inlined_call_operand.vmem [shape: f32[96,256], index: 2, kind: input, shape index: {}]   ;;  %s1228_s3 = inlined_call_operand.vmem [shape: f32[320,256], index: 3, kind: input, shape index: {}]   ;;  %s1229_s4 = inlined_call_operand.vmem [shape: f32[2,1,8,256], index: 4, kind: output, shape index: {}]  }
   0x1   :  { %s853_s17 = smov 0  }
   0x2 LB: > { %s26_s18 = sadd.s32 1, %s817_s16  ;;  %p754_p0 = scmp.ge.s32.totalorder %s821_s17, 1  ;;  %s821_s17 = sphi %s853_s17, %s14_s17   ;;  %s817_s16 = sphi %s851_s16, %s1231_s16   ;;  %s813_s15 = sphi %s849_s15, %s1230_s15  }
   0x3   : > { %p28_p1 = scmp.ge.s32.totalorder %s26_s18, 2  ;;  %p198_p2 = scmp.lt.s32.totalorder %s821_s17, 3 }
   0x5   : > { %s1233_s18 = smov (%p28_p1, %s26_s18), 0  ;;  %p199_p3 = pnand %p754_p0, %p198_p2 }
   0x6   : > { %p241_p4 = scmp.lt.s32.totalorder (!%p199_p3), %s813_s15, 1  ;;  %s823_s30 = smov (!%p199_p3), 32  }
   0x7   : > { %202 = sbr.rel (%p199_p3) target bundleno = 437 (0x1b5), region = 36 }
   0xc   : > { %v293_v0 = vld [vmem:[%s1227_s2 + $0xb8] sm:$0xff]  ;;  %v291_v1 = vld [vmem:[%s1227_s2 + $0xa8] sm:$0xff]  ;;  %v292_v4 = vld [vmem:[%s1227_s2 + $0xb0] sm:$0xff]  ;;  %s1235_s15 = smov (!%p241_p4, %s813_s15), 1  ;;  %vm298_vm0 = vcmask 785408   ;;  %vm484_vm4 = vcmask 1046528  }
   0xd   : > { %332 = vmatpush.msra.mxu1 %v293_v0  ;;  %v289_v2 = vld [vmem:[%s1227_s2 + $0x98] sm:$0xff]  ;;  %v287_v3 = vld [vmem:[%s1227_s2 + $0x88] sm:$0xff]  ;;  %v290_v5 = vld [vmem:[%s1227_s2 + $0xa0] sm:$0xff]  ;;  %309 = vmatpush.msra.mxu0 %v292_v4  ;;  %s771_s29 = sshll.u32 %s1235_s15, 4  ;;  %s772_s26 = sshll.u32 %s1235_s15, 5  ;;  %vm581_vm6 = vcmask 1045504  }
   0xe   : > { %v285_v6 = vld [vmem:[%s1227_s2 + $0x78] sm:$0xff]  ;;  %v288_v7 = vld [vmem:[%s1227_s2 + $0x90] sm:$0xff]  ;;  %v283_v8 = vld [vmem:[%s1227_s2 + $0x68] sm:$0xff]  ;;  %s249_s12 = scalar_lea.vmem %s1225_s0, %s771_s29  ;;  %s1064_s13 = scalar_lea.vmem %s1226_s1, %s772_s26  ;;  %vm438_vm7 = vcmask 261120  }
   0xf   : > { %333 = vmatpush.msra.mxu1 %v291_v1  ;;  %310 = vmatpush.msra.mxu0 %v290_v5  ;;  %v286_v9 = vld [vmem:[%s1227_s2 + $0x80] sm:$0xff]  ;;  %v281_v10 = vld [vmem:[%s1227_s2 + $0x58] sm:$0xff]  ;;  %v284_v11 = vld [vmem:[%s1227_s2 + $0x70] sm:$0xff] }
  0x10   : > { %v279_v12 = vld [vmem:[%s1227_s2 + $0x48] sm:$0xff]  ;;  %v282_v13 = vld [vmem:[%s1227_s2 + $0x60] sm:$0xff]  ;;  %v277_v14 = vld [vmem:[%s1227_s2 + $0x38] sm:$0xff] }
  0x11   : > { %334 = vmatpush.msra.mxu1 %v289_v2  ;;  %311 = vmatpush.msra.mxu0 %v288_v7  ;;  %v280_v15 = vld [vmem:[%s1227_s2 + $0x50] sm:$0xff]  ;;  %v275_v16 = vld [vmem:[%s1227_s2 + $0x28] sm:$0xff]  ;;  %v278_v17 = vld [vmem:[%s1227_s2 + $0x40] sm:$0xff] }
  0x12   : > { %v273_v18 = vld [vmem:[%s1227_s2 + $0x18] sm:$0xff]  ;;  %v276_v19 = vld [vmem:[%s1227_s2 + $0x30] sm:$0xff]  ;;  %v271_v20 = vld [vmem:[%s1227_s2 + $0x8] sm:$0xff] }
  0x13   : > { %335 = vmatpush.msra.mxu1 %v287_v3  ;;  %312 = vmatpush.msra.mxu0 %v286_v9  ;;  %v274_v21 = vld [vmem:[%s1227_s2 + $0x20] sm:$0xff]  ;;  %v272_v23 = vld [vmem:[%s1227_s2 + $0x10] sm:$0xff]  ;;  %v426_v24 = vld [vmem:[%s1228_s3 + $0x238] sm:$0xff] }
  0x14   : > { %v268_v22 = vld [vmem:[%s249_s12] sm:$0xff]  ;;  %v424_v26 = vld [vmem:[%s1228_s3 + $0x228] sm:$0xff]  ;;  %v422_v27 = vld [vmem:[%s1228_s3 + $0x218] sm:$0xff] }
  0x15   : > { %336 = vmatpush.msra.mxu1 %v285_v6  ;;  %313 = vmatpush.msra.mxu0 %v284_v11  ;;  %v270_v25 = vld [vmem:[%s1227_s2] sm:$0xff]  ;;  %v420_v28 = vld [vmem:[%s1228_s3 + $0x208] sm:$0xff]  ;;  %v418_v30 = vld [vmem:[%s1228_s3 + $0x1f8] sm:$0xff] }
  0x16   : > { %v269_v29 = vld [vmem:[%s249_s12 + $0x8] sm:$0x3]  ;;  %v414_v32 = vld [vmem:[%s1228_s3 + $0x1d8] sm:$0xff]  ;;  %v433_v44 = vld [vmem:[%s1228_s3 + $0x30] sm:$0xff] }
  0x17   : > { %337 = vmatpush.msra.mxu1 %v283_v8  ;;  %314 = vmatpush.msra.mxu0 %v282_v13  ;;  %v416_v31 = vld [vmem:[%s1228_s3 + $0x1e8] sm:$0xff]  ;;  %v410_v34 = vld [vmem:[%s1228_s3 + $0x1b8] sm:$0xff]  ;;  %v431_v46 = vld [vmem:[%s1228_s3 + $0x20] sm:$0xff] }
  0x18   : > { %v412_v33 = vld [vmem:[%s1228_s3 + $0x1c8] sm:$0xff]  ;;  %v406_v36 = vld [vmem:[%s1228_s3 + $0x198] sm:$0xff]  ;;  %453 = vmatpush.msra.mxu2 %v433_v44  ;;  %v429_v49 = vld [vmem:[%s1228_s3 + $0x10] sm:$0xff] }
  0x19   : > { %338 = vmatpush.msra.mxu1 %v281_v10  ;;  %315 = vmatpush.msra.mxu0 %v280_v15  ;;  %v408_v35 = vld [vmem:[%s1228_s3 + $0x1a8] sm:$0xff]  ;;  %v402_v38 = vld [vmem:[%s1228_s3 + $0x178] sm:$0xff]  ;;  %v427_v52 = vld [vmem:[%s1228_s3] sm:$0xff] }
  0x1a   : > { %v404_v37 = vld [vmem:[%s1228_s3 + $0x188] sm:$0xff]  ;;  %v398_v40 = vld [vmem:[%s1228_s3 + $0x158] sm:$0xff]  ;;  %454 = vmatpush.msra.mxu2 %v431_v46  ;;  %v393_v54 = vld [vmem:[%s1228_s3 + $0x130] sm:$0xff] }
  0x1b   : > { %339 = vmatpush.msra.mxu1 %v279_v12  ;;  %316 = vmatpush.msra.mxu0 %v278_v17  ;;  %v400_v39 = vld [vmem:[%s1228_s3 + $0x168] sm:$0xff]  ;;  %v394_v42 = vld [vmem:[%s1228_s3 + $0x138] sm:$0xff]  ;;  %v425_v56 = vld [vmem:[%s1228_s3 + $0x230] sm:$0xff] }
  0x1c   : > { %v396_v41 = vld [vmem:[%s1228_s3 + $0x148] sm:$0xff]  ;;  %v434_v45 = vld [vmem:[%s1228_s3 + $0x38] sm:$0xff]  ;;  %455 = vmatpush.msra.mxu2 %v429_v49  ;;  %v391_v57 = vld [vmem:[%s1228_s3 + $0x120] sm:$0xff] }
  0x1d   : > { %340 = vmatpush.msra.mxu1 %v277_v14  ;;  %317 = vmatpush.msra.mxu0 %v276_v19  ;;  %v392_v43 = vld [vmem:[%s1228_s3 + $0x128] sm:$0xff]  ;;  %v390_v47 = vld [vmem:[%s1228_s3 + $0x118] sm:$0xff]  ;;  %v423_v59 = vld [vmem:[%s1228_s3 + $0x220] sm:$0xff] }
  0x1e   : > { %473 = vmatpush.msra.mxu3 %v434_v45  ;;  %v432_v48 = vld [vmem:[%s1228_s3 + $0x28] sm:$0xff]  ;;  %v430_v50 = vld [vmem:[%s1228_s3 + $0x18] sm:$0xff]  ;;  %456 = vmatpush.msra.mxu2 %v427_v52  ;;  %v389_v60 = vld [vmem:[%s1228_s3 + $0x110] sm:$0xff] }
  0x1f   : > { %341 = vmatpush.msra.mxu1 %v275_v16  ;;  %318 = vmatpush.msra.mxu0 %v274_v21  ;;  %v388_v51 = vld [vmem:[%s1228_s3 + $0x108] sm:$0xff]  ;;  %v386_v55 = vld [vmem:[%s1228_s3 + $0xf8] sm:$0xff]  ;;  %v421_v62 = vld [vmem:[%s1228_s3 + $0x210] sm:$0xff] }
  0x20   : > { %474 = vmatpush.msra.mxu3 %v432_v48  ;;  %v428_v53 = vld [vmem:[%s1228_s3 + $0x8] sm:$0xff]  ;;  %493 = vmatpush.msrb.mxu2 %v393_v54  ;;  %v382_v61 = vld [vmem:[%s1228_s3 + $0xd8] sm:$0xff]  ;;  %v387_v63 = vld [vmem:[%s1228_s3 + $0x100] sm:$0xff] }
  0x21   : > { %342 = vmatpush.msra.mxu1 %v273_v18  ;;  %319 = vmatpush.msra.mxu0 %v272_v23  ;;  %v384_v58 = vld [vmem:[%s1228_s3 + $0xe8] sm:$0xff]  ;;  %v419_v1 = vld [vmem:[%s1228_s3 + $0x200] sm:$0xff]  ;;  %v385_v3 = vld [vmem:[%s1228_s3 + $0xf0] sm:$0xff] }
  0x22   : > { %475 = vmatpush.msra.mxu3 %v430_v50  ;;  %494 = vmatpush.msrb.mxu2 %v391_v57  ;;  %v380_v0 = vld [vmem:[%s1228_s3 + $0xc8] sm:$0xff]  ;;  %v378_v4 = vld [vmem:[%s1228_s3 + $0xb8] sm:$0xff]  ;;  %v417_v5 = vld [vmem:[%s1228_s3 + $0x1f0] sm:$0xff] }
  0x23   : > { %343 = vmatpush.msra.mxu1 %v271_v20  ;;  %320 = vmatpush.msra.mxu0 %v270_v25  ;;  %v295_v2 = vld [vmem:[%s1064_s13 + $0x8] sm:$0xff]  ;;  %v383_v7 = vld [vmem:[%s1228_s3 + $0xe0] sm:$0xff]  ;;  %v381_v12 = vld [vmem:[%s1228_s3 + $0xd0] sm:$0xff] }
  0x24   : > { %763 = vmatmul.msk.f32.vlgmr.msra.gmra.mxu1 %vm298_vm0, %v268_v22  ;;  %761 = vmatmul.msk.f32.vlgmr.msra.gmra.mxu0 %vm298_vm0, %v268_v22  ;;  %v376_v9 = vld [vmem:[%s1228_s3 + $0xa8] sm:$0xff]  ;;  %v415_v10 = vld [vmem:[%s1228_s3 + $0x1e0] sm:$0xff]  ;;  %v374_v14 = vld [vmem:[%s1228_s3 + $0x98] sm:$0xff] }
  0x25   : > { %553 = vmatpush.msrb.mxu1 %v426_v24  ;;  %533 = vmatpush.msrb.mxu0 %v394_v42  ;;  %v294_v11 = vld [vmem:[%s1064_s13] sm:$0xff]  ;;  %v413_v16 = vld [vmem:[%s1228_s3 + $0x1d0] sm:$0xff]  ;;  %v372_v20 = vld [vmem:[%s1228_s3 + $0x88] sm:$0xff] }
  0x26   : > { %476 = vmatpush.msra.mxu3 %v428_v53  ;;  %495 = vmatpush.msrb.mxu2 %v389_v60  ;;  %v379_v17 = vld [vmem:[%s1228_s3 + $0xc0] sm:$0xff]  ;;  %v297_v21 = vld [vmem:[%s1064_s13 + $0x18] sm:$0x3]  ;;  %v377_v23 = vld [vmem:[%s1228_s3 + $0xb0] sm:$0xff] }
  0x27   : > { %554 = vmatpush.msrb.mxu1 %v424_v26  ;;  %534 = vmatpush.msrb.mxu0 %v392_v43  ;;  %v411_v22 = vld [vmem:[%s1228_s3 + $0x1c0] sm:$0xff]  ;;  %v370_v24 = vld [vmem:[%s1228_s3 + $0x78] sm:$0xff]  ;;  %v409_v26 = vld [vmem:[%s1228_s3 + $0x1b0] sm:$0xff] }
  0x28   : > { %513 = vmatpush.msrb.mxu3 %v425_v56  ;;  %496 = vmatpush.msrb.mxu2 %v387_v63  ;;  %v371_v53 = vld [vmem:[%s1228_s3 + $0x80] sm:$0xff]  ;;  %v401_v56 = vld [vmem:[%s1228_s3 + $0x170] sm:$0xff] }
  0x29   : > { %555 = vmatpush.msrb.mxu1 %v422_v27  ;;  %535 = vmatpush.msrb.mxu0 %v390_v47  ;;  %v375_v27 = vld [vmem:[%s1228_s3 + $0xa0] sm:$0xff]  ;;  %v397_v60 = vld [vmem:[%s1228_s3 + $0x150] sm:$0xff] }
  0x2a   : > { %514 = vmatpush.msrb.mxu3 %v423_v59  ;;  %497 = vmatpush.msrb.mxu2 %v385_v3  ;;  %v403_v54 = vld [vmem:[%s1228_s3 + $0x180] sm:$0xff]  ;;  %v365_v59 = vld [vmem:[%s1228_s3 + $0x50] sm:$0xff]  ;;  %v578_v3 = vld [vmem:[%s1228_s3 + $0x268] sm:$0xff] }
  0x2b   : > { %556 = vmatpush.msrb.mxu1 %v420_v28  ;;  %536 = vmatpush.msrb.mxu0 %v388_v51  ;;  %v367_v57 = vld [vmem:[%s1228_s3 + $0x60] sm:$0xff]  ;;  %v579_v63 = vld [vmem:[%s1228_s3 + $0x270] sm:$0xff] }
  0x2c   : > { %764 = vmatmul.msk.f32.gmra.mxu1 %vm298_vm0, %v269_v29  ;;  %762 = vmatmul.msk.f32.gmra.mxu0 %vm298_vm0, %v269_v29 }
  0x2d   : > { %557 = vmatpush.msrb.mxu1 %v418_v30  ;;  %537 = vmatpush.msrb.mxu0 %v386_v55  ;;  %v368_v30 = vld [vmem:[%s1228_s3 + $0x68] sm:$0xff]  ;;  %v369_v55 = vld [vmem:[%s1228_s3 + $0x70] sm:$0xff] }
  0x2e   : > { %515 = vmatpush.msrb.mxu3 %v421_v62  ;;  %498 = vmatpush.msrb.mxu2 %v383_v7  ;;  %v395_v62 = vld [vmem:[%s1228_s3 + $0x140] sm:$0xff]  ;;  %v574_v7 = vld [vmem:[%s1228_s3 + $0x248] sm:$0xff] }
  0x2f   : > { %558 = vmatpush.msrb.mxu1 %v416_v31  ;;  %538 = vmatpush.msrb.mxu0 %v384_v58  ;;  %v296_v31 = vld [vmem:[%s1064_s13 + $0x10] sm:$0x3]  ;;  %v399_v58 = vld [vmem:[%s1228_s3 + $0x160] sm:$0xff]  ;;  %s267_s13 = scalar_lea.vmem %s1229_s4, %s771_s29 }
  0x30   : > { %516 = vmatpush.msrb.mxu3 %v419_v1  ;;  %499 = vmatpush.msrb.mxu2 %v381_v12 }
  0x31   : > { %559 = vmatpush.msrb.mxu1 %v414_v32  ;;  %539 = vmatpush.msrb.mxu0 %v382_v61  ;;  %v407_v32 = vld [vmem:[%s1228_s3 + $0x1a0] sm:$0xff] }
  0x32   : > { %517 = vmatpush.msrb.mxu3 %v417_v5  ;;  %500 = vmatpush.msrb.mxu2 %v379_v17  ;;  %v363_v61 = vld [vmem:[%s1228_s3 + $0x40] sm:$0xff]  ;;  %v576_v5 = vld [vmem:[%s1228_s3 + $0x258] sm:$0xff] }
  0x33   : > { %560 = vmatpush.msrb.mxu1 %v412_v33  ;;  %540 = vmatpush.msrb.mxu0 %v380_v0  ;;  %v373_v33 = vld [vmem:[%s1228_s3 + $0x90] sm:$0xff]  ;;  %v580_v0 = vld [vmem:[%s1228_s3 + $0x278] sm:$0xff] }
  0x34   : > { %518 = vmatpush.msrb.mxu3 %v415_v10  ;;  %501 = vmatpush.msrb.mxu2 %v377_v23 }
  0x35   : > { %561 = vmatpush.msrb.mxu1 %v410_v34  ;;  %541 = vmatpush.msrb.mxu0 %v378_v4  ;;  %v575_v4 = vld [vmem:[%s1228_s3 + $0x250] sm:$0xff] }
  0x36   : > { %519 = vmatpush.msrb.mxu3 %v413_v16  ;;  %502 = vmatpush.msrb.mxu2 %v375_v27 }
  0x37   : > { %562 = vmatpush.msrb.mxu1 %v408_v35  ;;  %542 = vmatpush.msrb.mxu0 %v376_v9  ;;  %v366_v35 = vld [vmem:[%s1228_s3 + $0x58] sm:$0xff] }
  0x38   : > { %520 = vmatpush.msrb.mxu3 %v411_v22  ;;  %503 = vmatpush.msrb.mxu2 %v373_v33 }
  0x39   : > { %563 = vmatpush.msrb.mxu1 %v406_v36  ;;  %543 = vmatpush.msrb.mxu0 %v374_v14 }
  0x3a   : > { %521 = vmatpush.msrb.mxu3 %v409_v26  ;;  %504 = vmatpush.msrb.mxu2 %v371_v53 }
  0x3b   : > { %564 = vmatpush.msrb.mxu1 %v404_v37  ;;  %544 = vmatpush.msrb.mxu0 %v372_v20  ;;  %v405_v37 = vld [vmem:[%s1228_s3 + $0x190] sm:$0xff] }
  0x3c   : > { %522 = vmatpush.msrb.mxu3 %v407_v32  ;;  %505 = vmatpush.msrb.mxu2 %v369_v55 }
  0x3d   : > { %565 = vmatpush.msrb.mxu1 %v402_v38  ;;  %545 = vmatpush.msrb.mxu0 %v370_v24 }
  0x3e   : > { %523 = vmatpush.msrb.mxu3 %v405_v37  ;;  %506 = vmatpush.msrb.mxu2 %v367_v57 }
  0x3f   : > { %566 = vmatpush.msrb.mxu1 %v400_v39  ;;  %546 = vmatpush.msrb.mxu0 %v368_v30 }
  0x40   : > { %524 = vmatpush.msrb.mxu3 %v403_v54  ;;  %507 = vmatpush.msrb.mxu2 %v365_v59 }
  0x41   : > { %567 = vmatpush.msrb.mxu1 %v398_v40  ;;  %547 = vmatpush.msrb.mxu0 %v366_v35 }
  0x42   : > { %525 = vmatpush.msrb.mxu3 %v401_v56  ;;  %508 = vmatpush.msrb.mxu2 %v363_v61 }
  0x43   : > { %568 = vmatpush.msrb.mxu1 %v396_v41  ;;  %v364_v41 = vld [vmem:[%s1228_s3 + $0x48] sm:$0xff] }
  0x44   : > { %548 = vmatpush.msrb.mxu0 %v364_v41  ;;  %526 = vmatpush.msrb.mxu3 %v399_v58 }
  0x46   : > { %527 = vmatpush.msrb.mxu3 %v397_v60 }
  0x48   : > { %528 = vmatpush.msrb.mxu3 %v395_v62 }
  0xa1   : > { %v345_v6 = vpop.f32.mrf.mxu1  ;;  %v322_v15 = vpop.f32.mrf.mxu0 }
  0xa2   : > { %v346_v8 = vadd.f32 %v345_v6, %v295_v2  ;;  %v323_v19 = vadd.f32 %v322_v15, %v294_v11  ;;  %v577_v2 = vld [vmem:[%s1228_s3 + $0x260] sm:$0xff] }
  0xa3   : > { %v573_v6 = vld [vmem:[%s1228_s3 + $0x240] sm:$0xff] }
  0xa4   : > { %vm352_vm1 = vcmp.gt.f32.partialorder %v346_v8, 0.0  ;;  %v356_v13 = vmul.f32 0.2, %v346_v8  ;;  %v355_v29 = vmul.f32 0.2, %v323_v19  ;;  %vm351_vm2 = vcmp.gt.f32.partialorder %v323_v19, 0.0 }
  0xa6   : > { %v360_v18 = vsel %vm352_vm1, %v346_v8, %v356_v13  ;;  %v359_v39 = vsel %vm351_vm2, %v323_v19, %v355_v29 }
  0xa7   : > { %436 = vrot.lane.b32.xlu0 %v360_v18, %s823_s30  ;;  %v488_v42 = vrot.slane %v360_v18, 1  ;;  %v485_v46 = vrot.slane %v359_v39, 1  ;;  %v582_v50 = vrot.slane %v359_v39, 2 }
  0xa9   : > { %v348_v25 = vpop.f32.mrf.mxu1  ;;  %v325_v36 = vpop.f32.mrf.mxu0 }
  0xaa   : > { %v349_v28 = vadd.f32 %v348_v25, %v297_v21  ;;  %v326_v40 = vadd.f32 %v325_v36, %v296_v31 }
  0xac   : > { %vm354_vm3 = vcmp.gt.f32.partialorder %v349_v28, 0.0  ;;  %v358_v34 = vmul.f32 0.2, %v349_v28  ;;  %vm353_vm5 = vcmp.gt.f32.partialorder %v326_v40, 0.0  ;;  %v357_v44 = vmul.f32 0.2, %v326_v40 }
  0xae   : > { %v362_v38 = vsel %vm354_vm3, %v349_v28, %v358_v34  ;;  %v361_v47 = vsel %vm353_vm5, %v326_v40, %v357_v44 }
  0xaf   : > { %v489_v43 = vrot.slane %v362_v38, 1  ;;  %v486_v48 = vrot.slane %v361_v47, 1  ;;  %v583_v51 = vrot.slane %v361_v47, 2 }
  0xb1   : > { %v490_v45 = vsel %vm484_vm4, %v488_v42, %v489_v43  ;;  %v487_v49 = vsel %vm484_vm4, %v485_v46, %v486_v48  ;;  %v584_v52 = vsel %vm581_vm6, %v582_v50, %v583_v51 }
  0xb2   : > { %569 = vmatmul.f32.vlgmr.msrb.gmra.mxu1 %v490_v45  ;;  %549 = vmatmul.f32.vlgmr.msrb.gmra.mxu0 %v487_v49 }
 0x119   : > { %v437_v1 = vpop.permute.xlu0 %436 }
 0x11a   : > { %765 = vmatmul.msk.f32.vlgmr.msra.gmra.mxu2 %vm438_vm7, %v437_v1  ;;  %766 = vmatmul.msk.f32.vlgmr.msra.gmra.mxu3 %vm438_vm7, %v437_v1 }
 0x11b   : > { %599 = vmatpush.msra.mxu2 %v579_v63  ;;  %619 = vmatpush.msra.mxu3 %v580_v0 }
 0x11d   : > { %600 = vmatpush.msra.mxu2 %v577_v2  ;;  %620 = vmatpush.msra.mxu3 %v578_v3 }
 0x11f   : > { %601 = vmatpush.msra.mxu2 %v575_v4  ;;  %621 = vmatpush.msra.mxu3 %v576_v5 }
 0x121   : > { %602 = vmatpush.msra.mxu2 %v573_v6  ;;  %622 = vmatpush.msra.mxu3 %v574_v7 }
 0x122   : > { %509 = vmatmul.f32.vlgmr.msrb.gmra.mxu2 %v487_v49  ;;  %529 = vmatmul.f32.vlgmr.msrb.gmra.mxu3 %v490_v45 }
 0x12a   : > { %767 = vmatmul.msk.f32.vlgmr.msra.gmra.mxu2 %vm438_vm7, %v584_v52  ;;  %768 = vmatmul.msk.f32.vlgmr.msra.gmra.mxu3 %vm438_vm7, %v584_v52 }
 0x12f   : > { %v550_v12 = vpop.f32.mrf.mxu0  ;;  %v570_v15 = vpop.f32.mrf.mxu1 }
 0x19d   : > { %v458_v8 = vpop.f32.mrf.mxu2  ;;  %v478_v9 = vpop.f32.mrf.mxu3 }
 0x19e   : > { %v551_v13 = vadd.f32 %v550_v12, %v478_v9 }
 0x1a0   : > { %v571_v17 = vadd.f32 %v570_v15, %v551_v13 }
 0x1a5   : > { %v510_v10 = vpop.f32.mrf.mxu2  ;;  %v530_v11 = vpop.f32.mrf.mxu3 }
 0x1a6   : > { %v511_v14 = vadd.f32 %v510_v10, %v458_v8 }
 0x1a8   : > { %v531_v16 = vadd.f32 %v530_v11, %v511_v14 }
 0x1ad   : > { %v604_v18 = vpop.f32.mrf.mxu2  ;;  %v624_v19 = vpop.f32.mrf.mxu3 }
 0x1ae   : > { %v627_v20 = vadd.f32 %v604_v18, %v531_v16  ;;  %v628_v21 = vadd.f32 %v624_v19, %v571_v17 }
 0x1b0   : > { %vm629_vm8 = vcmp.gt.f32.partialorder %v627_v20, 0.0  ;;  %v631_v22 = vmul.f32 0.2, %v627_v20  ;;  %vm630_vm9 = vcmp.gt.f32.partialorder %v628_v21, 0.0  ;;  %v632_v23 = vmul.f32 0.2, %v628_v21 }
 0x1b2   : > { %v633_v24 = vsel %vm629_vm8, %v627_v20, %v631_v22  ;;  %v634_v25 = vsel %vm630_vm9, %v628_v21, %v632_v23 }
 0x1b3   : > { %635 = vst [vmem:[%s267_s13] sm:$0xff] %v633_v24 }
 0x1b4   : > { %636 = vst [vmem:[%s267_s13 + $0x8] sm:$0xff] %v634_v25 }
 0x1b5 PF: > { %s14_s17 = sadd.s32 1, %s821_s17   ;;  %s1230_s15 = smov %s817_s16 }
 0x1b6   : > { %p11_p5 = scmp.ge.s32.totalorder %s14_s17, 4   ;;  %s1231_s16 = smov %s1233_s18 }
 0x1b8   :  { %13 = sbr.rel (!%p11_p5) target bundleno = 2 (0x2), region = 69 }

</bundles_post_ra>
